<compile_context>
chip_gen: v5e
topology: v5e:2x2
jax: 0.10.0
libtpu: 0.0.40
codegen_flags: <defaults>
</compile_context>

<pallas_src>
import jax
import jax.numpy as jnp
from jax import lax
from jax.experimental import pallas as pl
from jax.experimental.pallas import tpu as pltpu


def _aggregation_kernel(x1_ref, x2_ref, w1_ref, w2_ref, b_ref, o_ref, acc_ref):
    """One (tm, tn) output tile, accumulated over the K (hidden) grid axis.

    x1_ref, x2_ref: (tm, tk)  activation tiles
    w1_ref, w2_ref: (tn, tk)  weight tiles in PyTorch (out, in) layout
                              (w1 -> W[:, :H] tile, w2 -> W[:, H:] tile)
    b_ref         : (1, tn)   bias tile
    o_ref         : (tm, tn)  output tile
    acc_ref       : (tm, tn)  f32 accumulator scratch (resident across k)
    """
    k = pl.program_id(2)

    @pl.when(k == 0)
    def _():
        acc_ref[...] = jnp.zeros_like(acc_ref)

    cdt = w1_ref.dtype
    # Contract last (in-feature) dims: (tm, tk) x (tn, tk) -> (tm, tn).
    dn = (((1,), (1,)), ((), ()))
    acc_ref[...] += lax.dot_general(
        x1_ref[...].astype(cdt), w1_ref[...], dn,
        preferred_element_type=jnp.float32)
    acc_ref[...] += lax.dot_general(
        x2_ref[...].astype(cdt), w2_ref[...], dn,
        preferred_element_type=jnp.float32)

    @pl.when(k == pl.num_programs(2) - 1)
    def _():
        o_ref[...] = (acc_ref[...] + b_ref[...].astype(jnp.float32)).astype(
            o_ref.dtype)


def _pick_tile(dim, candidates):
    for t in candidates:
        if dim % t == 0:
            return t
    return dim


def _round_up(x, m):
    return (x + m - 1) // m * m


def _aggregation_pallas(x1, x2, w1, w2, bias, w2_col_offset):
    """x1/x2: (B, H); w1/w2: (H, >=H) arrays whose relevant half starts at
    column `w2_col_offset` (0 for w1); bias: (H,).
    Requires B % 8 == 0, H % 128 == 0, and w2_col_offset % tk == 0."""
    B, H = x1.shape

    tm = _pick_tile(B, (256, 128, 64, 32, 16, 8))
    tn = _pick_tile(H, (256, 512, 128))
    tk = _pick_tile(H, (256, 512, 128))
    grid = (B // tm, H // tn, H // tk)
    off = w2_col_offset // tk  # block-column offset of the x2 weight half

    b2d = bias.reshape(1, H)

    x_i = x1.dtype.itemsize
    w_i = w1.dtype.itemsize
    o_i = x1.dtype.itemsize
    b_i = bias.dtype.itemsize
    # Per-step VMEM footprint (inputs + output), double-buffered, + accumulator.
    step_bytes = 2 * tm * tk * x_i + 2 * tn * tk * w_i + tn * b_i + tm * tn * o_i
    vmem_needed = 2 * step_bytes + tm * tn * 4
    vmem_limit = int(min(max(4 * vmem_needed, 32 * 1024 * 1024),
                         64 * 1024 * 1024))  # explicit, v7x (64 MiB) safe

    cost = pl.CostEstimate(
        flops=2 * B * (2 * H) * H,
        transcendentals=0,
        bytes_accessed=(2 * H * H * w_i + 2 * B * H * x_i + H * b_i
                        + B * H * o_i),
    )

    return pl.pallas_call(
        _aggregation_kernel,
        out_shape=jax.ShapeDtypeStruct((B, H), x1.dtype),
        grid_spec=pltpu.PrefetchScalarGridSpec(
            num_scalar_prefetch=0,
            grid=grid,
            in_specs=[
                pl.BlockSpec((tm, tk), lambda i, j, k: (i, k)),        # x1
                pl.BlockSpec((tm, tk), lambda i, j, k: (i, k)),        # x2
                pl.BlockSpec((tn, tk), lambda i, j, k: (j, k)),        # W[:, :H]
                pl.BlockSpec((tn, tk), lambda i, j, k: (j, k + off)),  # W[:, H:]
                pl.BlockSpec((1, tn), lambda i, j, k: (0, j)),         # bias
            ],
            out_specs=pl.BlockSpec((tm, tn), lambda i, j, k: (i, j)),
            scratch_shapes=[pltpu.VMEM((tm, tn), jnp.float32)],
        ),
        compiler_params=pltpu.CompilerParams(
            dimension_semantics=("parallel", "parallel", "arbitrary"),
            vmem_limit_bytes=vmem_limit,
        ),
        cost_estimate=cost,
    )(x1, x2, w1, w2, b2d)


def aggregation_function(x1, x2, weight, bias):
    """Pallas implementation of AggregationFunction.forward.

    Args:
      x1, x2: (B, H)
      weight: (H, 2H)  (PyTorch nn.Linear layout, no transpose needed)
      bias:   (H,)
    Returns:
      (B, H) in x1.dtype.
    """
    B, H = x1.shape
    assert x2.shape == (B, H)
    assert weight.shape == (H, 2 * H)
    assert bias.shape == (H,)

    if B % 8 == 0 and H % 128 == 0:
        # Fast path: pass the PyTorch weight twice (zero-copy); the second
        # BlockSpec index map is shifted by H columns to address W[:, H:].
        return _aggregation_pallas(x1, x2, weight, weight, bias, H)

    # Unaligned (tiny) shapes: zero-pad once to (8, 128)-aligned sizes so the
    # kernel keeps lane-dense unmasked stores, then slice the result back.
    # For production, do this padding once at parameter-init time instead.
    Bp, Hp = _round_up(B, 8), _round_up(H, 128)
    pad_x = ((0, Bp - B), (0, Hp - H))
    x1p = jnp.pad(x1, pad_x)
    x2p = jnp.pad(x2, pad_x)
    pad_w = ((0, Hp - H), (0, Hp - H))
    w1p = jnp.pad(weight[:, :H], pad_w)
    w2p = jnp.pad(weight[:, H:], pad_w)
    biasp = jnp.pad(bias, (0, Hp - H))
    out = _aggregation_pallas(x1p, x2p, w1p, w2p, biasp, 0)
    return out[:B, :H]


def init_params(key, hidden_dim, dtype=jnp.float32):
    """nn.Linear(2H, H) default init: U(+-1/sqrt(fan_in)), fan_in = 2H."""
    k_w, k_b = jax.random.split(key)
    bound = 1.0 / jnp.sqrt(2.0 * hidden_dim)
    weight = jax.random.uniform(
        k_w, (hidden_dim, 2 * hidden_dim), jnp.float32, -bound, bound)
    bias = jax.random.uniform(
        k_b, (hidden_dim,), jnp.float32, -bound, bound)
    return weight.astype(dtype), bias.astype(dtype)


if __name__ == "__main__":
    key = jax.random.PRNGKey(0)

    def reference(x1, x2, w, b):
        comb = jnp.concatenate([x1, x2], axis=-1).astype(jnp.float32)
        return jnp.dot(comb, w.astype(jnp.float32).T,
                       precision=jax.lax.Precision.HIGHEST) + b.astype(jnp.float32)

    checks = [
        # (batch, hidden, dtype, tol)
        (2, 32, jnp.float32, 2e-2),     # tiny / unaligned -> padded path
        (32, 256, jnp.float32, 2e-2),   # aligned, single-block grid
        (64, 512, jnp.float32, 2e-2),   # aligned, multi-block (n, k) grid
        (64, 512, jnp.bfloat16, 5e-2),  # bf16 weight/activation stream
    ]
    for idx, (batch, hidden, dtype, tol) in enumerate(checks):
        k1, k2, kp = jax.random.split(jax.random.fold_in(key, idx), 3)
        x1 = jax.random.normal(k1, (batch, hidden), jnp.float32).astype(dtype)
        x2 = jax.random.normal(k2, (batch, hidden), jnp.float32).astype(dtype)
        weight, bias = init_params(kp, hidden, dtype)

        out = jax.block_until_ready(aggregation_function(x1, x2, weight, bias))
        ref = reference(x1, x2, weight, bias)

        assert out.shape == (batch, hidden), (out.shape, batch, hidden)
        err = jnp.max(jnp.abs(out.astype(jnp.float32) - ref))
        assert jnp.allclose(out.astype(jnp.float32), ref, atol=tol, rtol=tol), (
            f"mismatch at batch={batch} hidden={hidden} dtype={dtype}: "
            f"max abs err {err}")

    print("KERNEL_OK")
</pallas_src>

<mosaic_0001>
module attributes {stable_mosaic.version = 11 : i64} {
  func.func @_aggregation_kernel(%arg0: i32, %arg1: i32, %arg2: i32, %arg3: memref<8x128xf32, #tpu.memory_space<vmem>>, %arg4: memref<8x128xf32, #tpu.memory_space<vmem>>, %arg5: memref<128x128xf32, #tpu.memory_space<vmem>>, %arg6: memref<128x128xf32, #tpu.memory_space<vmem>>, %arg7: memref<1x128xf32, #tpu.memory_space<vmem>>, %arg8: memref<8x128xf32, #tpu.memory_space<vmem>>, %arg9: memref<8x128xf32, #tpu.memory_space<vmem>>) attributes {dimension_semantics = [#tpu.dimension_semantics<parallel>, #tpu.dimension_semantics<parallel>, #tpu.dimension_semantics<arbitrary>], iteration_bounds = array<i64: 1, 1, 1>, scalar_prefetch = 0 : i64, scratch_operands = 1 : i64, tpu.core_type = #tpu.core_type<tc>, window_params = [{transform_indices = @transform_0, window_bounds = array<i64: 8, 128>}, {transform_indices = @transform_1, window_bounds = array<i64: 8, 128>}, {transform_indices = @transform_2, window_bounds = array<i64: 128, 128>}, {transform_indices = @transform_3, window_bounds = array<i64: 128, 128>}, {transform_indices = @transform_4, window_bounds = array<i64: 1, 128>}, {transform_indices = @transform_5, window_bounds = array<i64: 8, 128>}]} {
    %c0_i32 = arith.constant 0 : i32
    %0 = arith.cmpi eq, %arg2, %c0_i32 : i32
    %1 = arith.extui %0 : i1 to i32
    %c0_i32_0 = arith.constant 0 : i32
    %2 = arith.cmpi ne, %1, %c0_i32_0 : i32
    scf.if %2 {
      %cst_19 = arith.constant 0.000000e+00 : f32
      %18 = vector.broadcast %cst_19 : f32 to vector<8x128xf32>
      %c0_20 = arith.constant 0 : index
      %c0_21 = arith.constant 0 : index
      %19 = vector.load %arg9[%c0_20, %c0_21] : memref<8x128xf32, #tpu.memory_space<vmem>>, vector<8x128xf32>
      tpu.vector_store %arg9[%c0_20, %c0_21], %18 {strides = array<i32>} : memref<8x128xf32, #tpu.memory_space<vmem>>, vector<8x128xf32>,
    } else {
    }
    %c0 = arith.constant 0 : index
    %c0_1 = arith.constant 0 : index
    %3 = vector.load %arg9[%c0, %c0_1] : memref<8x128xf32, #tpu.memory_space<vmem>>, vector<8x128xf32>
    %c0_2 = arith.constant 0 : index
    %c0_3 = arith.constant 0 : index
    %4 = vector.load %arg3[%c0_2, %c0_3] : memref<8x128xf32, #tpu.memory_space<vmem>>, vector<8x128xf32>
    %c0_4 = arith.constant 0 : index
    %c0_5 = arith.constant 0 : index
    %5 = vector.load %arg5[%c0_4, %c0_5] : memref<128x128xf32, #tpu.memory_space<vmem>>, vector<128x128xf32>
    %cst = arith.constant dense<0.000000e+00> : vector<8x128xf32>
    %6 = tpu.matmul %4, %5, %cst {dimension_numbers = #tpu.dot_dimension_numbers<[1], [1], [0], [0], [0, 0, 1, 0], [], []>} : vector<8x128xf32>, vector<128x128xf32>, vector<8x128xf32> -> vector<8x128xf32>
    %7 = arith.addf %3, %6 : vector<8x128xf32>
    %c0_6 = arith.constant 0 : index
    %c0_7 = arith.constant 0 : index
    %8 = vector.load %arg9[%c0_6, %c0_7] : memref<8x128xf32, #tpu.memory_space<vmem>>, vector<8x128xf32>
    tpu.vector_store %arg9[%c0_6, %c0_7], %7 {strides = array<i32>} : memref<8x128xf32, #tpu.memory_space<vmem>>, vector<8x128xf32>,
    %c0_8 = arith.constant 0 : index
    %c0_9 = arith.constant 0 : index
    %9 = vector.load %arg9[%c0_8, %c0_9] : memref<8x128xf32, #tpu.memory_space<vmem>>, vector<8x128xf32>
    %c0_10 = arith.constant 0 : index
    %c0_11 = arith.constant 0 : index
    %10 = vector.load %arg4[%c0_10, %c0_11] : memref<8x128xf32, #tpu.memory_space<vmem>>, vector<8x128xf32>
    %c0_12 = arith.constant 0 : index
    %c0_13 = arith.constant 0 : index
    %11 = vector.load %arg6[%c0_12, %c0_13] : memref<128x128xf32, #tpu.memory_space<vmem>>, vector<128x128xf32>
    %cst_14 = arith.constant dense<0.000000e+00> : vector<8x128xf32>
    %12 = tpu.matmul %10, %11, %cst_14 {dimension_numbers = #tpu.dot_dimension_numbers<[1], [1], [0], [0], [0, 0, 1, 0], [], []>} : vector<8x128xf32>, vector<128x128xf32>, vector<8x128xf32> -> vector<8x128xf32>
    %13 = arith.addf %9, %12 : vector<8x128xf32>
    %c0_15 = arith.constant 0 : index
    %c0_16 = arith.constant 0 : index
    %14 = vector.load %arg9[%c0_15, %c0_16] : memref<8x128xf32, #tpu.memory_space<vmem>>, vector<8x128xf32>
    tpu.vector_store %arg9[%c0_15, %c0_16], %13 {strides = array<i32>} : memref<8x128xf32, #tpu.memory_space<vmem>>, vector<8x128xf32>,
    %c0_i32_17 = arith.constant 0 : i32
    %15 = arith.cmpi eq, %arg2, %c0_i32_17 : i32
    %16 = arith.extui %15 : i1 to i32
    %c0_i32_18 = arith.constant 0 : i32
    %17 = arith.cmpi ne, %16, %c0_i32_18 : i32
    scf.if %17 {
      %c0_19 = arith.constant 0 : index
      %c0_20 = arith.constant 0 : index
      %18 = vector.load %arg9[%c0_19, %c0_20] : memref<8x128xf32, #tpu.memory_space<vmem>>, vector<8x128xf32>
      %c0_21 = arith.constant 0 : index
      %c0_22 = arith.constant 0 : index
      %19 = vector.load %arg7[%c0_21, %c0_22] : memref<1x128xf32, #tpu.memory_space<vmem>>, vector<1x128xf32>
      %20 = vector.broadcast %19 : vector<1x128xf32> to vector<8x128xf32>
      %21 = arith.addf %18, %20 : vector<8x128xf32>
      %c0_23 = arith.constant 0 : index
      %c0_24 = arith.constant 0 : index
      %22 = vector.load %arg8[%c0_23, %c0_24] : memref<8x128xf32, #tpu.memory_space<vmem>>, vector<8x128xf32>
      tpu.vector_store %arg8[%c0_23, %c0_24], %21 {strides = array<i32>} : memref<8x128xf32, #tpu.memory_space<vmem>>, vector<8x128xf32>,
    } else {
    }
    return
  }
  func.func @transform_0(%arg0: i32, %arg1: i32, %arg2: i32) -> (i32, i32) {
    %c0_i32 = arith.constant 0 : i32
    return %arg0, %arg2 : i32, i32
  }
  func.func @transform_1(%arg0: i32, %arg1: i32, %arg2: i32) -> (i32, i32) {
    %c0_i32 = arith.constant 0 : i32
    return %arg0, %arg2 : i32, i32
  }
  func.func @transform_2(%arg0: i32, %arg1: i32, %arg2: i32) -> (i32, i32) {
    %c0_i32 = arith.constant 0 : i32
    return %arg1, %arg2 : i32, i32
  }
  func.func @transform_3(%arg0: i32, %arg1: i32, %arg2: i32) -> (i32, i32) {
    %c0_i32 = arith.constant 0 : i32
    %0 = arith.addi %arg2, %c0_i32 : i32
    %c0_i32_0 = arith.constant 0 : i32
    return %arg1, %0 : i32, i32
  }
  func.func @transform_4(%arg0: i32, %arg1: i32, %arg2: i32) -> (i32, i32) {
    %c0_i32 = arith.constant 0 : i32
    %c0_i32_0 = arith.constant 0 : i32
    return %c0_i32, %arg1 : i32, i32
  }
  func.func @transform_5(%arg0: i32, %arg1: i32, %arg2: i32) -> (i32, i32) {
    %c0_i32 = arith.constant 0 : i32
    return %arg0, %arg1 : i32, i32
  }
}

</mosaic_0001>

<bundles_post_ra>
// kernel: tpu_custom_call.1
= control target key start
LH: loop header
LB: loop body
LE: loop exit
PB: predicated region body
PF: predicated region fallthrough
CT: control target
= control target key end

     0   :  { %10 = vsyncpa [#allocation4], 0  ;;  %s385_s0 = inlined_call_operand.hbm [shape: f32[8,128], index: 0, kind: input, shape index: {}]   ;;  %s386_s1 = inlined_call_operand.hbm [shape: f32[8,128], index: 1, kind: input, shape index: {}]   ;;  %s387_s2 = inlined_call_operand.hbm [shape: f32[128,128], index: 2, kind: input, shape index: {}]   ;;  %s388_s3 = inlined_call_operand.hbm [shape: f32[128,128], index: 3, kind: input, shape index: {}]   ;;  %s389_s4 = inlined_call_operand.vmem [shape: f32[1,128], index: 4, kind: input, shape index: {}]   ;;  %s390_s5 = inlined_call_operand.hbm [shape: f32[8,128], index: 5, kind: output, shape index: {}]  }
   0x1   :  { %11 = vsyncpa [#allocation7], 0 }
   0x2   :  { %12 = vsyncpa [#allocation10], 0  ;;  %s30_s20 = sshll.u32 %s386_s1, 4  ;;  %s31_s20 = int_to_ptr.hbm [resolvable:$true] %s30_s20 }
   0x3   :  { %13 = vsyncpa [#allocation5], 0  ;;  %s330_s21 = smov [#allocation6]   ;;  %s19_s25 = sshll.u32 %s385_s0, 4  ;;  %s20_s25 = int_to_ptr.hbm [resolvable:$true] %s19_s25 }
   0x4   :  { %s32_s22 = sshll.u32 %s330_s21, 4  ;;  %s331_s26 = smov [#allocation3]   ;;  %s33_s22 = int_to_ptr.vmem [resolvable:$true] %s32_s22 }
   0x5   :  { %35 = dma.hbm_to_vmem [thread:$0]  %s31_s20, 128, %s33_s22, [#allocation7]  }
   0x6   :  { %s21_s27 = sshll.u32 %s331_s26, 4  ;;  %s40_s30 = sshll.u32 %s387_s2, 4  ;;  %s22_s27 = int_to_ptr.vmem [resolvable:$true] %s21_s27  ;;  %s41_s30 = int_to_ptr.hbm [resolvable:$true] %s40_s30 }
   0x7   :  { %24 = dma.hbm_to_vmem [thread:$0]  %s20_s25, 128, %s22_s27, [#allocation4]  }
   0x8   :  { %s332_s1 = smov [#allocation8]   ;;  %s53_s9 = sshll.u32 %s388_s3, 4  ;;  %s54_s9 = int_to_ptr.hbm [resolvable:$true] %s53_s9 }
   0x9   :  { %s42_s6 = sshll.u32 %s332_s1, 4  ;;  %s333_s10 = smov 128   ;;  %s43_s6 = int_to_ptr.vmem [resolvable:$true] %s42_s6 }
   0xa   :  { %s334_s0 = smov 8   ;;  %s335_s11 = smov [#allocation9]  }
   0xb   :  { %48 = dma.hbm_to_vmem [thread:$0]  %s41_s30, 2048, %s43_s6, [#allocation7], %s333_s10, %s333_s10, %s334_s0  }
   0xc   :  { %s55_s12 = sshll.u32 %s335_s11, 4  ;;  %s56_s12 = int_to_ptr.vmem [resolvable:$true] %s55_s12 }
   0xd   :  { %61 = dma.hbm_to_vmem [thread:$0]  %s54_s9, 2048, %s56_s12, [#allocation10], %s333_s10, %s333_s10, %s334_s0  }
   0xe   :  { %322 = dma.done.wait [#allocation4], 128  }
   0xf   :  { %323 = vsyncadd [#allocation4], 4294967168 }
  0x10   :  { %324 = dma.done.wait [#allocation7], 2176  }
  0x11   :  { %325 = vsyncadd [#allocation7], 4294965120 }
  0x12   :  { %326 = dma.done.wait [#allocation10], 2048  }
  0x13   :  { %327 = vsyncadd [#allocation10], 4294965248  ;;  %v102_v0 = vld [vmem:[#allocation8 + $0x78] sm:$0xff]  ;;  %v101_v2 = vld [vmem:[#allocation8 + $0x70] sm:$0xff]  ;;  %s336_s13 = smov [#allocation11]   ;;  %s182_s17 = sshll.u32 %s390_s5, 4  ;;  %s183_s17 = int_to_ptr.hbm [resolvable:$true] %s182_s17 }
  0x14   :  { %v142_v1 = vld [vmem:[#allocation9 + $0x78] sm:$0xff]  ;;  %103 = vmatpush.xpose.msra.mxu0 %v102_v0  ;;  %v141_v3 = vld [vmem:[#allocation9 + $0x70] sm:$0xff]  ;;  %v100_v4 = vld [vmem:[#allocation8 + $0x68] sm:$0xff]  ;;  %s180_s14 = sshll.u32 %s336_s13, 4  ;;  %s181_s14 = int_to_ptr.vmem [resolvable:$true] %s180_s14 }
  0x15   :  { %143 = vmatpush.xpose.msra.mxu1 %v142_v1  ;;  %v140_v5 = vld [vmem:[#allocation9 + $0x68] sm:$0xff]  ;;  %v99_v6 = vld [vmem:[#allocation8 + $0x60] sm:$0xff]  ;;  %v98_v8 = vld [vmem:[#allocation8 + $0x58] sm:$0xff] }
  0x16   :  { %v139_v7 = vld [vmem:[#allocation9 + $0x60] sm:$0xff]  ;;  %v138_v9 = vld [vmem:[#allocation9 + $0x58] sm:$0xff]  ;;  %v97_v10 = vld [vmem:[#allocation8 + $0x50] sm:$0xff] }
  0x17   :  { %v137_v11 = vld [vmem:[#allocation9 + $0x50] sm:$0xff]  ;;  %v96_v12 = vld [vmem:[#allocation8 + $0x48] sm:$0xff]  ;;  %v95_v14 = vld [vmem:[#allocation8 + $0x40] sm:$0xff] }
  0x18   :  { %104 = vmatpush.xpose.msra.mxu0 %v101_v2  ;;  %v136_v13 = vld [vmem:[#allocation9 + $0x48] sm:$0xff]  ;;  %v135_v15 = vld [vmem:[#allocation9 + $0x40] sm:$0xff]  ;;  %v94_v16 = vld [vmem:[#allocation8 + $0x38] sm:$0xff] }
  0x19   :  { %144 = vmatpush.xpose.msra.mxu1 %v141_v3  ;;  %v134_v17 = vld [vmem:[#allocation9 + $0x38] sm:$0xff]  ;;  %v93_v18 = vld [vmem:[#allocation8 + $0x30] sm:$0xff]  ;;  %v92_v20 = vld [vmem:[#allocation8 + $0x28] sm:$0xff] }
  0x1a   :  { %v133_v19 = vld [vmem:[#allocation9 + $0x30] sm:$0xff]  ;;  %v132_v21 = vld [vmem:[#allocation9 + $0x28] sm:$0xff]  ;;  %v91_v22 = vld [vmem:[#allocation8 + $0x20] sm:$0xff] }
  0x1b   :  { %v131_v23 = vld [vmem:[#allocation9 + $0x20] sm:$0xff]  ;;  %v90_v24 = vld [vmem:[#allocation8 + $0x18] sm:$0xff]  ;;  %v89_v26 = vld [vmem:[#allocation8 + $0x10] sm:$0xff] }
  0x1c   :  { %105 = vmatpush.xpose.msra.mxu0 %v100_v4  ;;  %v130_v25 = vld [vmem:[#allocation9 + $0x18] sm:$0xff]  ;;  %v129_v27 = vld [vmem:[#allocation9 + $0x10] sm:$0xff]  ;;  %v88_v28 = vld [vmem:[#allocation8 + $0x8] sm:$0xff] }
  0x1d   :  { %145 = vmatpush.xpose.msra.mxu1 %v140_v5  ;;  %v128_v29 = vld [vmem:[#allocation9 + $0x8] sm:$0xff]  ;;  %v87_v30 = vld [vmem:[#allocation8] sm:$0xff]  ;;  %v86_v32 = vld [vmem:[#allocation3] sm:$0xff] }
  0x1e   :  { %v127_v31 = vld [vmem:[#allocation9] sm:$0xff]  ;;  %v126_v33 = vld [vmem:[#allocation6] sm:$0xff]  ;;  %v201_v34 = vld [vmem:[%s389_s4] ss:$0 sm:$0xff] }
  0x20   :  { %106 = vmatpush.xpose.msra.mxu0 %v99_v6 }
  0x21   :  { %146 = vmatpush.xpose.msra.mxu1 %v139_v7 }
  0x24   :  { %107 = vmatpush.xpose.msra.mxu0 %v98_v8 }
  0x25   :  { %147 = vmatpush.xpose.msra.mxu1 %v138_v9 }
  0x28   :  { %108 = vmatpush.xpose.msra.mxu0 %v97_v10 }
  0x29   :  { %148 = vmatpush.xpose.msra.mxu1 %v137_v11 }
  0x2c   :  { %109 = vmatpush.xpose.msra.mxu0 %v96_v12 }
  0x2d   :  { %149 = vmatpush.xpose.msra.mxu1 %v136_v13 }
  0x30   :  { %110 = vmatpush.xpose.msra.mxu0 %v95_v14 }
  0x31   :  { %150 = vmatpush.xpose.msra.mxu1 %v135_v15 }
  0x34   :  { %111 = vmatpush.xpose.msra.mxu0 %v94_v16 }
  0x35   :  { %151 = vmatpush.xpose.msra.mxu1 %v134_v17 }
  0x38   :  { %112 = vmatpush.xpose.msra.mxu0 %v93_v18 }
  0x39   :  { %152 = vmatpush.xpose.msra.mxu1 %v133_v19 }
  0x3c   :  { %113 = vmatpush.xpose.msra.mxu0 %v92_v20 }
  0x3d   :  { %153 = vmatpush.xpose.msra.mxu1 %v132_v21 }
  0x40   :  { %114 = vmatpush.xpose.msra.mxu0 %v91_v22 }
  0x41   :  { %154 = vmatpush.xpose.msra.mxu1 %v131_v23 }
  0x44   :  { %115 = vmatpush.xpose.msra.mxu0 %v90_v24 }
  0x45   :  { %155 = vmatpush.xpose.msra.mxu1 %v130_v25 }
  0x48   :  { %116 = vmatpush.xpose.msra.mxu0 %v89_v26 }
  0x49   :  { %156 = vmatpush.xpose.msra.mxu1 %v129_v27 }
  0x4c   :  { %117 = vmatpush.xpose.msra.mxu0 %v88_v28 }
  0x4d   :  { %157 = vmatpush.xpose.msra.mxu1 %v128_v29 }
  0x50   :  { %118 = vmatpush.xpose.msra.mxu0 %v87_v30 }
  0x51   :  { %158 = vmatpush.xpose.msra.mxu1 %v127_v31 }
  0x53   :  { %119 = vmatmul.f32.vlgmr.msra.gmra.mxu0 %v86_v32 }
  0x54   :  { %159 = vmatmul.f32.vlgmr.msra.gmra.mxu1 %v126_v33 }
  0xd0   :  { %v120_v35 = vpop.f32.mrf.mxu0 }
  0xd1   :  { %v160_v36 = vpop.f32.mrf.mxu1 }
  0xd2   :  { %v163_v37 = vadd.f32 %v160_v36, %v120_v35 }
  0xd4   :  { %v173_v38 = vadd.f32 %v201_v34, %v163_v37 }
  0xd6   :  { %174 = vst [vmem:[#allocation11] sm:$0xff] %v173_v38 }
  0xd7   :  { %185 = dma.vmem_to_hbm [thread:$0]  %s181_s14, 128, %s183_s17, [#allocation5]  }
  0xd8   :  { %328 = dma.done.wait [#allocation5], 128  }
  0xd9   :  { %329 = vsyncadd [#allocation5], 4294967168 }
  0xda   :  { %190 = vsyncpa [#allocation4], 1 }
  0xdb   :  { %191 = vsyncpa [#allocation7], 1 }
  0xdc   :  { %192 = vsyncpa [#allocation10], 1 }
  0xdd   :  { %193 = vsyncpa [#allocation5], 1 }

</bundles_post_ra>
